<compile_context>
chip_gen: v7x
topology: tpu7x:2x2x1
jax: 0.10.0
libtpu: 0.0.40
codegen_flags: <defaults>
</compile_context>

<pallas_src>
import jax
import jax.numpy as jnp
from jax.experimental import pallas as pl
from jax.experimental.pallas import tpu as pltpu

BN_EPS = 1e-5
LANE = 128
_TILE_TARGET_BYTES = 2 << 20  # ~2 MiB of (input + output) block per grid step


def _round_up(x, m):
    return (x + m - 1) // m * m


def _stats_kernel(x_ref, wt_ref, sum_ref, sq_ref):
    """Pass 1: relu + block-diagonal 1x1 convs, per-tile partial BN stats.

    x_ref  : [1, 2C, tile_s]   channel-major tile of the concatenated subsamples
    wt_ref : [out_ch, 2C]      block-diag([w1^T, w2^T])
    sum_ref: [1, 1, out_ch, 1] per-tile per-channel sum of y
    sq_ref : [1, 1, out_ch, 1] per-tile per-channel sum of y^2
    """
    a = jnp.maximum(x_ref[0], 0.0)                                      # ReLU (VPU)
    y = jnp.dot(wt_ref[...], a, preferred_element_type=jnp.float32)     # [out_ch, tile_s] (MXU)
    sum_ref[0, 0] = jnp.sum(y, axis=-1, keepdims=True)                  # cross-lane reduce (XLU)
    sq_ref[0, 0] = jnp.sum(y * y, axis=-1, keepdims=True)


def _apply_kernel(x_ref, ws_ref, shift_ref, o_ref):
    """Pass 2: recompute the cheap matmul with BN scale folded into the weights,
    add the folded shift, write the final lane-dense output tile."""
    a = jnp.maximum(x_ref[0], 0.0)
    y = jnp.dot(ws_ref[...], a, preferred_element_type=jnp.float32)     # [out_ch, tile_s]
    o_ref[0] = (y + shift_ref[...]).astype(o_ref.dtype)


def shortcut_forward(x, w1, w2, gamma, beta, *, stride):
    """x: NCHW float32.  w1/w2: [in_ch, out_ch//2].  gamma/beta: [out_ch]."""
    N, C, H, W = x.shape
    half = w1.shape[1]
    out_ch = 2 * half
    two_c = 2 * C

    # --- subsample / shifted subsample (stays channel-major, no relayout)
    x1 = x[:, :, ::stride, ::stride]                      # avg_pool2d(k=1, stride=s)
    Ho, Wo = x1.shape[2], x1.shape[3]
    x2 = x[:, :, 1::stride, 1::stride]                    # (+1,+1)-shifted subsample
    ph, pw = Ho - x2.shape[2], Wo - x2.shape[3]
    if ph or pw:                                          # zero fill at the far edge
        x2 = jnp.pad(x2, ((0, 0), (0, 0), (0, ph), (0, pw)))
    x12 = jnp.concatenate([x1, x2], axis=1).reshape(N, two_c, Ho * Wo)   # [N, 2C, S]

    # --- spatial tiling (lane axis), byte-based tile size, zero-pad (stats-safe)
    S = Ho * Wo
    bytes_per_col = (two_c + out_ch) * 4
    max_cols = max(LANE, (_TILE_TARGET_BYTES // bytes_per_col) // LANE * LANE)
    tile_s = min(max_cols, _round_up(S, LANE))
    S_pad = _round_up(S, tile_s)
    if S_pad != S:
        x12 = jnp.pad(x12, ((0, 0), (0, 0), (0, S_pad - S)))
    num_t = S_pad // tile_s

    # --- block-diag([w1^T, w2^T]) : both convs + channel concat as one matmul
    dt = x.dtype
    z = jnp.zeros((half, C), dt)
    wt = jnp.concatenate(
        [jnp.concatenate([w1.T.astype(dt), z], axis=1),
         jnp.concatenate([z, w2.T.astype(dt)], axis=1)], axis=0)          # [out_ch, 2C]

    # --- pass 1: per-tile partial BN statistics (both grid axes parallel)
    sums, sqs = pl.pallas_call(
        _stats_kernel,
        out_shape=(jax.ShapeDtypeStruct((N, num_t, out_ch, 1), jnp.float32),
                   jax.ShapeDtypeStruct((N, num_t, out_ch, 1), jnp.float32)),
        grid_spec=pltpu.PrefetchScalarGridSpec(
            num_scalar_prefetch=0,
            grid=(N, num_t),
            in_specs=[pl.BlockSpec((1, two_c, tile_s), lambda n, t: (n, 0, t)),
                      pl.BlockSpec((out_ch, two_c), lambda n, t: (0, 0))],
            out_specs=(pl.BlockSpec((1, 1, out_ch, 1), lambda n, t: (n, t, 0, 0)),
                       pl.BlockSpec((1, 1, out_ch, 1), lambda n, t: (n, t, 0, 0))),
        ),
        compiler_params=pltpu.CompilerParams(
            dimension_semantics=("parallel", "parallel"),
            vmem_limit_bytes=32 * 1024 * 1024,
        ),
    )(x12, wt)

    # --- tiny XLA epilogue: reduce partials, fold BN into (scaled weights, shift)
    cnt = jnp.float32(N * S)                              # true element count per channel
    ssum = jnp.sum(sums, axis=(0, 1)).reshape(out_ch)
    ssq = jnp.sum(sqs, axis=(0, 1)).reshape(out_ch)
    mean = ssum / cnt
    var = ssq / cnt - mean * mean                         # biased, training-mode variance
    scale = gamma.reshape(-1).astype(jnp.float32) * jax.lax.rsqrt(var + BN_EPS)
    shift = (beta.reshape(-1).astype(jnp.float32) - mean * scale).reshape(out_ch, 1)
    ws = wt.astype(jnp.float32) * scale.reshape(out_ch, 1)  # scale folded into the weights

    # --- pass 2: recompute matmul + folded BN, write final output (lane-dense)
    out = pl.pallas_call(
        _apply_kernel,
        out_shape=jax.ShapeDtypeStruct((N, out_ch, S_pad), x.dtype),
        grid_spec=pltpu.PrefetchScalarGridSpec(
            num_scalar_prefetch=0,
            grid=(N, num_t),
            in_specs=[pl.BlockSpec((1, two_c, tile_s), lambda n, t: (n, 0, t)),
                      pl.BlockSpec((out_ch, two_c), lambda n, t: (0, 0)),
                      pl.BlockSpec((out_ch, 1), lambda n, t: (0, 0))],
            out_specs=pl.BlockSpec((1, out_ch, tile_s), lambda n, t: (n, 0, t)),
        ),
        compiler_params=pltpu.CompilerParams(
            dimension_semantics=("parallel", "parallel"),
            vmem_limit_bytes=32 * 1024 * 1024,
        ),
    )(x12, ws, shift)

    # [N, out_ch, S_pad] -> [N, out_ch, Ho, Wo]  (already NCHW; no transpose needed)
    return out[:, :, :S].reshape(N, out_ch, Ho, Wo)


def reference_forward(x, w1, w2, gamma, beta, stride):
    """Pure-JAX reference for the correctness check."""
    h = jnp.maximum(x, 0.0)
    h1 = h[:, :, ::stride, ::stride]
    h2 = jnp.pad(h[:, :, 1:, 1:], ((0, 0), (0, 0), (0, 1), (0, 1)))[:, :, ::stride, ::stride]
    y1 = jnp.einsum("nchw,co->nohw", h1, w1)
    y2 = jnp.einsum("nchw,co->nohw", h2, w2)
    y = jnp.concatenate([y1, y2], axis=1)
    mean = jnp.mean(y, axis=(0, 2, 3), keepdims=True)
    var = jnp.mean((y - mean) ** 2, axis=(0, 2, 3), keepdims=True)
    g = gamma.reshape(1, -1, 1, 1)
    b = beta.reshape(1, -1, 1, 1)
    return (y - mean) * jax.lax.rsqrt(var + BN_EPS) * g + b


if __name__ == "__main__":
    # Small shapes consistent with the module: N=2, in_ch=4, H=W=16, out_ch=8, stride=2
    N, in_ch, H, W = 2, 4, 16, 16
    out_ch, stride = 8, 2
    half = out_ch // 2

    key = jax.random.PRNGKey(0)
    kx, kw1, kw2, kg, kb = jax.random.split(key, 5)

    x = jax.random.normal(kx, (N, in_ch, H, W), dtype=jnp.float32)

    # conv weights stored as [in_ch, out_half] (transpose of PyTorch's [out_half, in_ch, 1, 1])
    bound = 1.0 / (in_ch ** 0.5)
    w1 = jax.random.uniform(kw1, (in_ch, half), jnp.float32, -bound, bound)
    w2 = jax.random.uniform(kw2, (in_ch, half), jnp.float32, -bound, bound)
    gamma = jax.random.uniform(kg, (out_ch,), jnp.float32, 0.5, 1.5)
    beta = jax.random.uniform(kb, (out_ch,), jnp.float32, -0.5, 0.5)

    fwd = jax.jit(shortcut_forward, static_argnames=("stride",))
    out = jax.block_until_ready(fwd(x, w1, w2, gamma, beta, stride=stride))

    ref = reference_forward(x, w1, w2, gamma, beta, stride)
    assert out.shape == (N, out_ch, H // stride, W // stride), out.shape
    max_err = float(jnp.max(jnp.abs(out - ref)))
    assert jnp.allclose(out, ref, atol=1e-4, rtol=1e-4), max_err

    print("KERNEL_OK")
</pallas_src>

<mosaic_0001>
module attributes {stable_mosaic.version = 11 : i64} {
  func.func @_stats_kernel(%arg0: i32, %arg1: i32, %arg2: memref<1x8x128xf32, #tpu.memory_space<vmem>>, %arg3: memref<8x8xf32, #tpu.memory_space<vmem>>, %arg4: memref<1x1x8x1xf32, #tpu.memory_space<vmem>>, %arg5: memref<1x1x8x1xf32, #tpu.memory_space<vmem>>) attributes {dimension_semantics = [#tpu.dimension_semantics<parallel>, #tpu.dimension_semantics<parallel>], iteration_bounds = array<i64: 2, 1>, scalar_prefetch = 0 : i64, scratch_operands = 0 : i64, tpu.core_type = #tpu.core_type<tc>, window_params = [{transform_indices = @transform_0, window_bounds = array<i64: 1, 8, 128>}, {pipeline_mode = #tpu.pipeline_mode<synchronous>, transform_indices = @transform_1, window_bounds = array<i64: 8, 8>}, {transform_indices = @transform_2, window_bounds = array<i64: 1, 1, 8, 1>}, {transform_indices = @transform_3, window_bounds = array<i64: 1, 1, 8, 1>}]} {
    %c0 = arith.constant 0 : index
    %c0_0 = arith.constant 0 : index
    %c0_1 = arith.constant 0 : index
    %0 = vector.load %arg2[%c0, %c0_0, %c0_1] : memref<1x8x128xf32, #tpu.memory_space<vmem>>, vector<1x8x128xf32>
    %1 = vector.shape_cast %0 : vector<1x8x128xf32> to vector<8x128xf32>
    %cst = arith.constant 0.000000e+00 : f32
    %2 = vector.broadcast %cst : f32 to vector<8x128xf32>
    %3 = arith.maximumf %1, %2 : vector<8x128xf32>
    %c0_2 = arith.constant 0 : index
    %c0_3 = arith.constant 0 : index
    %4 = vector.load %arg3[%c0_2, %c0_3] : memref<8x8xf32, #tpu.memory_space<vmem>>, vector<8x8xf32>
    %cst_4 = arith.constant dense<0.000000e+00> : vector<8x128xf32>
    %5 = tpu.matmul %4, %3, %cst_4 {dimension_numbers = #tpu.dot_dimension_numbers<[1], [0], [0], [1], [0, 0, 1, 1], [], []>} : vector<8x8xf32>, vector<8x128xf32>, vector<8x128xf32> -> vector<8x128xf32>
    %cst_5 = arith.constant dense<0.000000e+00> : vector<8xf32>
    %6 = vector.multi_reduction <add>, %5, %cst_5 [1] : vector<8x128xf32> to vector<8xf32>
    %7 = vector.shape_cast %6 : vector<8xf32> to vector<8x1xf32>
    %c0_6 = arith.constant 0 : index
    %c0_7 = arith.constant 0 : index
    %c0_8 = arith.constant 0 : index
    %c0_9 = arith.constant 0 : index
    %8 = vector.load %arg4[%c0_6, %c0_7, %c0_8, %c0_9] : memref<1x1x8x1xf32, #tpu.memory_space<vmem>>, vector<1x1x8x1xf32>
    %9 = vector.shape_cast %8 : vector<1x1x8x1xf32> to vector<8x1xf32>
    %10 = vector.shape_cast %7 : vector<8x1xf32> to vector<1x1x8x1xf32>
    tpu.vector_store %arg4[%c0_6, %c0_7, %c0_8, %c0_9], %10 {strides = array<i32>} : memref<1x1x8x1xf32, #tpu.memory_space<vmem>>, vector<1x1x8x1xf32>,
    %11 = arith.mulf %5, %5 : vector<8x128xf32>
    %cst_10 = arith.constant dense<0.000000e+00> : vector<8xf32>
    %12 = vector.multi_reduction <add>, %11, %cst_10 [1] : vector<8x128xf32> to vector<8xf32>
    %13 = vector.shape_cast %12 : vector<8xf32> to vector<8x1xf32>
    %c0_11 = arith.constant 0 : index
    %c0_12 = arith.constant 0 : index
    %c0_13 = arith.constant 0 : index
    %c0_14 = arith.constant 0 : index
    %14 = vector.load %arg5[%c0_11, %c0_12, %c0_13, %c0_14] : memref<1x1x8x1xf32, #tpu.memory_space<vmem>>, vector<1x1x8x1xf32>
    %15 = vector.shape_cast %14 : vector<1x1x8x1xf32> to vector<8x1xf32>
    %16 = vector.shape_cast %13 : vector<8x1xf32> to vector<1x1x8x1xf32>
    tpu.vector_store %arg5[%c0_11, %c0_12, %c0_13, %c0_14], %16 {strides = array<i32>} : memref<1x1x8x1xf32, #tpu.memory_space<vmem>>, vector<1x1x8x1xf32>,
    return
  }
  func.func @transform_0(%arg0: i32, %arg1: i32) -> (i32, i32, i32) {
    %c0_i32 = arith.constant 0 : i32
    %c0_i32_0 = arith.constant 0 : i32
    return %arg0, %c0_i32, %arg1 : i32, i32, i32
  }
  func.func @transform_1(%arg0: i32, %arg1: i32) -> (i32, i32) {
    %c0_i32 = arith.constant 0 : i32
    %c0_i32_0 = arith.constant 0 : i32
    %c0_i32_1 = arith.constant 0 : i32
    return %c0_i32, %c0_i32_0 : i32, i32
  }
  func.func @transform_2(%arg0: i32, %arg1: i32) -> (i32, i32, i32, i32) {
    %c0_i32 = arith.constant 0 : i32
    %c0_i32_0 = arith.constant 0 : i32
    %c0_i32_1 = arith.constant 0 : i32
    return %arg0, %arg1, %c0_i32, %c0_i32_0 : i32, i32, i32, i32
  }
  func.func @transform_3(%arg0: i32, %arg1: i32) -> (i32, i32, i32, i32) {
    %c0_i32 = arith.constant 0 : i32
    %c0_i32_0 = arith.constant 0 : i32
    %c0_i32_1 = arith.constant 0 : i32
    return %arg0, %arg1, %c0_i32, %c0_i32_0 : i32, i32, i32, i32
  }
}

module attributes {stable_mosaic.version = 11 : i64} {
  func.func @_apply_kernel(%arg0: i32, %arg1: i32, %arg2: memref<1x8x128xf32, #tpu.memory_space<vmem>>, %arg3: memref<8x8xf32, #tpu.memory_space<vmem>>, %arg4: memref<8x1xf32, #tpu.memory_space<vmem>>, %arg5: memref<1x8x128xf32, #tpu.memory_space<vmem>>) attributes {dimension_semantics = [#tpu.dimension_semantics<parallel>, #tpu.dimension_semantics<parallel>], iteration_bounds = array<i64: 2, 1>, scalar_prefetch = 0 : i64, scratch_operands = 0 : i64, tpu.core_type = #tpu.core_type<tc>, window_params = [{transform_indices = @transform_0, window_bounds = array<i64: 1, 8, 128>}, {pipeline_mode = #tpu.pipeline_mode<synchronous>, transform_indices = @transform_1, window_bounds = array<i64: 8, 8>}, {pipeline_mode = #tpu.pipeline_mode<synchronous>, transform_indices = @transform_2, window_bounds = array<i64: 8, 1>}, {transform_indices = @transform_3, window_bounds = array<i64: 1, 8, 128>}]} {
    %c0 = arith.constant 0 : index
    %c0_0 = arith.constant 0 : index
    %c0_1 = arith.constant 0 : index
    %0 = vector.load %arg2[%c0, %c0_0, %c0_1] : memref<1x8x128xf32, #tpu.memory_space<vmem>>, vector<1x8x128xf32>
    %1 = vector.shape_cast %0 : vector<1x8x128xf32> to vector<8x128xf32>
    %cst = arith.constant 0.000000e+00 : f32
    %2 = vector.broadcast %cst : f32 to vector<8x128xf32>
    %3 = arith.maximumf %1, %2 : vector<8x128xf32>
    %c0_2 = arith.constant 0 : index
    %c0_3 = arith.constant 0 : index
    %4 = vector.load %arg3[%c0_2, %c0_3] : memref<8x8xf32, #tpu.memory_space<vmem>>, vector<8x8xf32>
    %cst_4 = arith.constant dense<0.000000e+00> : vector<8x128xf32>
    %5 = tpu.matmul %4, %3, %cst_4 {dimension_numbers = #tpu.dot_dimension_numbers<[1], [0], [0], [1], [0, 0, 1, 1], [], []>} : vector<8x8xf32>, vector<8x128xf32>, vector<8x128xf32> -> vector<8x128xf32>
    %c0_5 = arith.constant 0 : index
    %c0_6 = arith.constant 0 : index
    %6 = vector.load %arg4[%c0_5, %c0_6] : memref<8x1xf32, #tpu.memory_space<vmem>>, vector<8x1xf32>
    %7 = vector.broadcast %6 : vector<8x1xf32> to vector<8x128xf32>
    %8 = arith.addf %5, %7 : vector<8x128xf32>
    %c0_7 = arith.constant 0 : index
    %c0_8 = arith.constant 0 : index
    %c0_9 = arith.constant 0 : index
    %9 = vector.load %arg5[%c0_7, %c0_8, %c0_9] : memref<1x8x128xf32, #tpu.memory_space<vmem>>, vector<1x8x128xf32>
    %10 = vector.shape_cast %9 : vector<1x8x128xf32> to vector<8x128xf32>
    %11 = vector.shape_cast %8 : vector<8x128xf32> to vector<1x8x128xf32>
    tpu.vector_store %arg5[%c0_7, %c0_8, %c0_9], %11 {strides = array<i32>} : memref<1x8x128xf32, #tpu.memory_space<vmem>>, vector<1x8x128xf32>,
    return
  }
  func.func @transform_0(%arg0: i32, %arg1: i32) -> (i32, i32, i32) {
    %c0_i32 = arith.constant 0 : i32
    %c0_i32_0 = arith.constant 0 : i32
    return %arg0, %c0_i32, %arg1 : i32, i32, i32
  }
  func.func @transform_1(%arg0: i32, %arg1: i32) -> (i32, i32) {
    %c0_i32 = arith.constant 0 : i32
    %c0_i32_0 = arith.constant 0 : i32
    %c0_i32_1 = arith.constant 0 : i32
    return %c0_i32, %c0_i32_0 : i32, i32
  }
  func.func @transform_2(%arg0: i32, %arg1: i32) -> (i32, i32) {
    %c0_i32 = arith.constant 0 : i32
    %c0_i32_0 = arith.constant 0 : i32
    %c0_i32_1 = arith.constant 0 : i32
    return %c0_i32, %c0_i32_0 : i32, i32
  }
  func.func @transform_3(%arg0: i32, %arg1: i32) -> (i32, i32, i32) {
    %c0_i32 = arith.constant 0 : i32
    %c0_i32_0 = arith.constant 0 : i32
    return %arg0, %c0_i32, %arg1 : i32, i32, i32
  }
}

</mosaic_0001>

<bundles_post_ra>
// kernel: shortcut_forward.2
= control target key start
LH: loop header
LB: loop body
LE: loop exit
PB: predicated region body
PF: predicated region fallthrough
CT: control target
= control target key end

     0   :  { %s506_s12 = smov 0   ;;  %s508_s13 = smov 0   ;;  %s545_s0 = inlined_call_operand.vmem [shape: f32[2,8,128], index: 0, kind: input, shape index: {}]   ;;  %s546_s1 = inlined_call_operand.vmem [shape: f32[8,8], index: 1, kind: input, shape index: {}]   ;;  %s547_s2 = inlined_call_operand.vmem [shape: f32[2,1,8,1], index: 2, kind: output, shape index: {0}]   ;;  %s548_s3 = inlined_call_operand.vmem [shape: f32[2,1,8,1], index: 3, kind: output, shape index: {1}]  }
   0x1   :  { %s510_s14 = smov 0  }
   0x2 LB: > { %s26_s15 = sadd.s32 1, %s478_s13  ;;  %p420_p0 = scmp.ge.s32.totalorder %s482_s14, 1  ;;  %s482_s14 = sphi %s510_s14, %s14_s14   ;;  %s478_s13 = sphi %s508_s13, %s550_s13   ;;  %s474_s12 = sphi %s506_s12, %s549_s12  }
   0x3   : > { %p28_p1 = scmp.ge.s32.totalorder %s26_s15, 2  ;;  %p160_p2 = scmp.lt.s32.totalorder %s482_s14, 3 }
   0x5   : > { %s552_s15 = smov (%p28_p1, %s26_s15), 0  ;;  %p161_p3 = pnand %p420_p0, %p160_p2 }
   0x6   : > { %p195_p4 = scmp.lt.s32.totalorder (!%p161_p3), %s474_s12, 1  ;;  %v484_v0 = vmov (!%p161_p3), 0.0   ;;  %vm485_vm0 = vmmov (!%p161_p3), 0   ;;  %v218_v3 = vld [vmem:[%s546_s1] sm:$0xff] (!%p161_p3)  ;;  %vm219_vm1 = vcmask (!%p161_p3), 64512   ;;  %vm295_vm2 = vcmask (!%p161_p3), 7168  }
   0x7   : > { %164 = sbr.rel (%p161_p3) target bundleno = 380 (0x17c), region = 28  ;;  %429 = vmatprep.subr.mxu0 (!%p161_p3), %v484_v0  ;;  %431 = vmatprep.mubr.msk.f32.mxu0 (!%p161_p3), %vm485_vm0, %v484_v0 }
   0xe   : > { %s554_s12 = smov (!%p195_p4, %s474_s12), 1 }
   0xf   : > { %s421_s16 = sshll.u32 %s554_s12, 3 }
  0x10   : > { %s201_s19 = scalar_lea.vmem %s545_s0, %s421_s16  ;;  %s208_s24 = scalar_lea.vmem %s547_s2, %s421_s16 }
  0x11   : > { %v216_v1 = vld [vmem:[%s201_s19] sm:$0xff]  ;;  %s215_s27 = scalar_lea.vmem %s548_s3, %s421_s16 }
  0x12   : > { %v217_v2 = vmax.f32 %v216_v1, 0.0 }
  0x14   : > { %430 = vmatpush3.msra.mxu0 %v217_v2 }
  0x15   : > { %432 = vmatmul.mubr.msk.f32.vlgmr.msra.gmra.mrb[0].mxu0 %vm219_vm1, %v218_v3 }
  0xe8   : > { %v289_v4 = vpop.f32.mrb[0].mxu0 }
  0xe9   : > { %293 = vadd.xlane.f32.xlu0 %v289_v4  ;;  %v433_v5 = vpop.f32.mrb[1].mxu0  ;;  %v297_v6 = vmul.f32 %v289_v4, %v289_v4 }
  0xed   : > { %298 = vadd.xlane.f32.xlu0 %v297_v6 }
 0x176   : > { %v294_v7 = vpop.xlane.xlu0 %293 }
 0x177   : > { %296 = vst.msk [vmem:[%s208_s24] sm:$0xff] %vm295_vm2, %v294_v7 }
 0x17a   : > { %v299_v8 = vpop.xlane.xlu0 %298 }
 0x17b   : > { %300 = vst.msk [vmem:[%s215_s27] sm:$0xff] %vm295_vm2, %v299_v8 }
 0x17c PF: > { %s14_s14 = sadd.s32 1, %s482_s14   ;;  %s549_s12 = smov %s478_s13 }
 0x17d   : > { %p11_p5 = scmp.ge.s32.totalorder %s14_s14, 4   ;;  %s550_s13 = smov %s552_s15 }
 0x17f   :  { %13 = sbr.rel (!%p11_p5) target bundleno = 2 (0x2), region = 70 }

// kernel: shortcut_forward.3
= control target key start
LH: loop header
LB: loop body
LE: loop exit
PB: predicated region body
PF: predicated region fallthrough
CT: control target
= control target key end

     0   :  { %s447_s12 = smov 0   ;;  %s449_s13 = smov 0   ;;  %s486_s0 = inlined_call_operand.vmem [shape: f32[2,8,128], index: 0, kind: input, shape index: {}]   ;;  %s487_s1 = inlined_call_operand.vmem [shape: f32[8,8], index: 1, kind: input, shape index: {}]   ;;  %s488_s2 = inlined_call_operand.vmem [shape: f32[8,1], index: 2, kind: input, shape index: {}]   ;;  %s489_s3 = inlined_call_operand.vmem [shape: f32[2,8,128], index: 3, kind: output, shape index: {}]  }
   0x1   :  { %s451_s14 = smov 0  }
   0x2 LB: > { %s25_s15 = sadd.s32 1, %s418_s13  ;;  %p359_p0 = scmp.ge.s32.totalorder %s422_s14, 1  ;;  %s422_s14 = sphi %s451_s14, %s13_s14   ;;  %s418_s13 = sphi %s449_s13, %s491_s13   ;;  %s414_s12 = sphi %s447_s12, %s490_s12  }
   0x3   : > { %p27_p1 = scmp.ge.s32.totalorder %s25_s15, 2  ;;  %p155_p2 = scmp.lt.s32.totalorder %s422_s14, 3 }
   0x5   : > { %s493_s15 = smov (%p27_p1, %s25_s15), 0  ;;  %p156_p3 = pnand %p359_p0, %p155_p2 }
   0x6   : > { %p183_p4 = scmp.lt.s32.totalorder (!%p156_p3), %s414_s12, 1  ;;  %v424_v0 = vmov (!%p156_p3), 0.0   ;;  %vm425_vm0 = vmmov (!%p156_p3), 0   ;;  %v200_v1 = vld [vmem:[%s488_s2] sm:$0xff] (!%p156_p3)  ;;  %v426_v2 = vmov (!%p156_p3), 0   ;;  %vm206_vm1 = vcmask (!%p156_p3), 64512  }
   0x7   : > { %159 = sbr.rel (%p156_p3) target bundleno = 236 (0xec), region = 32  ;;  %367 = vmatprep.subr.mxu0 (!%p156_p3), %v424_v0  ;;  %369 = vmatprep.mubr.msk.f32.mxu0 (!%p156_p3), %vm425_vm0, %v424_v0  ;;  %v199_v5 = vld [vmem:[%s487_s1] sm:$0xff] (!%p156_p3) }
   0x8   : > { %399 = vset.pattern.permute.xlu0 (!%p156_p3), %v426_v2 }
   0x9   : > { %203 = vperm.xlu0 (!%p156_p3), %399, %v200_v1  }
   0xe   : > { %s495_s12 = smov (!%p183_p4, %s414_s12), 1 }
   0xf   : > { %s360_s18 = sshll.u32 %s495_s12, 3 }
  0x10   : > { %s189_s21 = scalar_lea.vmem %s486_s0, %s360_s18  ;;  %s196_s26 = scalar_lea.vmem %s489_s3, %s360_s18 }
  0x11   : > { %v197_v3 = vld [vmem:[%s189_s21] sm:$0xff] }
  0x12   : > { %v198_v4 = vmax.f32 %v197_v3, 0.0 }
  0x14   : > { %368 = vmatpush3.msra.mxu0 %v198_v4 }
  0x15   : > { %370 = vmatmul.mubr.msk.f32.vlgmr.msra.gmra.mrb[0].mxu0 %vm206_vm1, %v199_v5 }
  0x88   : > { %v204_v6 = vpop.permute.xlu0 %203 }
  0xe8   : > { %v276_v7 = vpop.f32.mrb[0].mxu0 }
  0xe9   : > { %v277_v8 = vadd.f32 %v276_v7, %v204_v6  ;;  %v371_v9 = vpop.f32.mrb[1].mxu0 }
  0xeb   : > { %280 = vst [vmem:[%s196_s26] sm:$0xff] %v277_v8 }
  0xec PF: > { %s13_s14 = sadd.s32 1, %s422_s14   ;;  %s490_s12 = smov %s418_s13 }
  0xed   : > { %p10_p5 = scmp.ge.s32.totalorder %s13_s14, 4   ;;  %s491_s13 = smov %s493_s15 }
  0xef   :  { %12 = sbr.rel (!%p10_p5) target bundleno = 2 (0x2), region = 62 }

</bundles_post_ra>
